<compile_context>
chip_gen: v6e
topology: v6e:2x2x1
jax: 0.10.0
libtpu: 0.0.40
codegen_flags: <defaults>
</compile_context>

<pallas_src>
import functools

import jax
import jax.numpy as jnp
from jax import lax
from jax.experimental import pallas as pl
from jax.experimental.pallas import tpu as pltpu

_BN_EPS = 1e-5


def _round_up(n: int, m: int) -> int:
    return (n + m - 1) // m * m


def _pad_to(a, shape):
    pads = [(0, t - s) for s, t in zip(a.shape, shape)]
    if all(p == (0, 0) for p in pads):
        return a
    return jnp.pad(a, pads)


# ----------------------------- pass 1 ---------------------------------------
def _pass1_kernel(x_ref, w1_ref, b1_ref, y_ref, sum_ref, ssq_ref, *,
                  batch, block_m, matmul_dtype):
    i = pl.program_id(0)

    x = x_ref[...].astype(matmul_dtype)
    w1 = w1_ref[...].astype(matmul_dtype)
    y = jnp.dot(x, w1, preferred_element_type=jnp.float32) + b1_ref[...]
    y_ref[...] = y

    # Masked partial statistics (padded batch rows excluded).
    rows = i * block_m + lax.broadcasted_iota(jnp.int32, y.shape, 0)
    yv = jnp.where(rows < batch, y, 0.0)
    s = jnp.sum(yv, axis=0, keepdims=True)          # (1, D)
    sq = jnp.sum(yv * yv, axis=0, keepdims=True)    # (1, D)
    sum_ref[...] = jnp.broadcast_to(s, sum_ref.shape)   # (1, 8, D)
    ssq_ref[...] = jnp.broadcast_to(sq, ssq_ref.shape)


# ----------------------------- pass 2 ---------------------------------------
def _pass2_kernel(y_ref, scale_ref, shift_ref, w2_ref, b2_ref, o_ref, *,
                  matmul_dtype):
    y = y_ref[...]
    # Folded BN: scale = gamma * rsqrt(var+eps), shift = beta - mean*scale.
    h = jnp.maximum(y * scale_ref[...] + shift_ref[...], 0.0)
    r = jnp.dot(h.astype(matmul_dtype), w2_ref[...].astype(matmul_dtype),
                preferred_element_type=jnp.float32) + b2_ref[...]
    o_ref[...] = (y + r).astype(o_ref.dtype)


# ----------------------------- wrapper ---------------------------------------
def resblock_forward(x, w1, b1, gamma, beta, w2, b2, *,
                     block_m=256, matmul_dtype=jnp.float32):
    """x: (B, in_dim); w1: (in_dim, out_dim); w2: (out_dim, out_dim);
    b1, b2, gamma, beta: (1, out_dim). Returns (B, out_dim) float32."""
    B, in_dim = x.shape
    out_dim = w1.shape[1]

    k_pad = _round_up(in_dim, 128)        # matmul K, lane-aligned
    d_pad = _round_up(out_dim, 128)       # feature / lane axis
    tm = min(_round_up(block_m, 8), _round_up(B, 8))
    b_pad = _round_up(B, tm)
    nb = b_pad // tm

    f32 = jnp.float32
    xp = _pad_to(x.astype(f32), (b_pad, k_pad))
    w1p = _pad_to(w1.astype(f32), (k_pad, d_pad))
    b1p = _pad_to(b1.astype(f32), (1, d_pad))
    gp = _pad_to(gamma.astype(f32), (1, d_pad))
    bp = _pad_to(beta.astype(f32), (1, d_pad))
    w2p = _pad_to(w2.astype(f32), (d_pad, d_pad))
    b2p = _pad_to(b2.astype(f32), (1, d_pad))

    # VMEM budget: double-buffered batch tiles + resident weights (+ headroom).
    need1 = 4 * (2 * tm * k_pad + k_pad * d_pad + 2 * d_pad
                 + 2 * tm * d_pad + 4 * 8 * d_pad)
    need2 = 4 * (2 * tm * d_pad + 4 * d_pad + d_pad * d_pad + 2 * tm * d_pad)
    vmem_limit = int(min(64 * 1024 * 1024,
                         max(32 * 1024 * 1024, 2 * max(need1, need2))))
    cparams = pltpu.CompilerParams(
        dimension_semantics=("parallel",),
        vmem_limit_bytes=vmem_limit,
    )

    # ---- pass 1: y = x@W1+b1, masked partial sums -------------------------
    cost1 = pl.CostEstimate(
        flops=2 * b_pad * k_pad * d_pad + 4 * b_pad * d_pad,
        transcendentals=0,
        bytes_accessed=4 * (b_pad * k_pad + k_pad * d_pad + d_pad
                            + b_pad * d_pad + 2 * nb * 8 * d_pad),
    )
    y_pad, psum, psq = pl.pallas_call(
        functools.partial(_pass1_kernel, batch=B, block_m=tm,
                          matmul_dtype=matmul_dtype),
        grid=(nb,),
        in_specs=[
            pl.BlockSpec((tm, k_pad), lambda i: (i, 0)),
            pl.BlockSpec((k_pad, d_pad), lambda i: (0, 0)),   # resident W1
            pl.BlockSpec((1, d_pad), lambda i: (0, 0)),       # resident b1
        ],
        out_specs=[
            pl.BlockSpec((tm, d_pad), lambda i: (i, 0)),
            pl.BlockSpec((1, 8, d_pad), lambda i: (i, 0, 0)),
            pl.BlockSpec((1, 8, d_pad), lambda i: (i, 0, 0)),
        ],
        out_shape=(
            jax.ShapeDtypeStruct((b_pad, d_pad), jnp.float32),
            jax.ShapeDtypeStruct((nb, 8, d_pad), jnp.float32),
            jax.ShapeDtypeStruct((nb, 8, d_pad), jnp.float32),
        ),
        compiler_params=cparams,
        cost_estimate=cost1,
    )(xp, w1p, b1p)

    # ---- tiny cross-tile stats reduction + BN folding (plain JAX) ---------
    total_sum = psum[:, 0, :].sum(axis=0)          # (d_pad,)
    total_sq = psq[:, 0, :].sum(axis=0)
    mean = total_sum / B
    var = jnp.maximum(total_sq / B - mean * mean, 0.0)   # biased (training) var
    inv_std = lax.rsqrt(var + _BN_EPS)
    scale = (gp[0] * inv_std)[None, :]             # (1, d_pad)
    shift = (bp[0] - mean * gp[0] * inv_std)[None, :]

    # ---- pass 2: normalize + ReLU + h@W2+b2 + residual add -----------------
    cost2 = pl.CostEstimate(
        flops=2 * b_pad * d_pad * d_pad + 6 * b_pad * d_pad,
        transcendentals=0,
        bytes_accessed=4 * (2 * b_pad * d_pad + d_pad * d_pad + 3 * d_pad),
    )
    out_pad = pl.pallas_call(
        functools.partial(_pass2_kernel, matmul_dtype=matmul_dtype),
        grid=(nb,),
        in_specs=[
            pl.BlockSpec((tm, d_pad), lambda i: (i, 0)),
            pl.BlockSpec((1, d_pad), lambda i: (0, 0)),       # resident scale
            pl.BlockSpec((1, d_pad), lambda i: (0, 0)),       # resident shift
            pl.BlockSpec((d_pad, d_pad), lambda i: (0, 0)),   # resident W2
            pl.BlockSpec((1, d_pad), lambda i: (0, 0)),       # resident b2
        ],
        out_specs=pl.BlockSpec((tm, d_pad), lambda i: (i, 0)),
        out_shape=jax.ShapeDtypeStruct((b_pad, d_pad), jnp.float32),
        compiler_params=cparams,
        cost_estimate=cost2,
    )(y_pad, scale, shift, w2p, b2p)

    return out_pad[:B, :out_dim]


# ----------------------------- reference & test ------------------------------
def _xavier_normal(key, fan_in, fan_out):
    std = (2.0 / (fan_in + fan_out)) ** 0.5
    return std * jax.random.normal(key, (fan_in, fan_out), dtype=jnp.float32)


def reference_forward(x, w1, b1, gamma, beta, w2, b2):
    y = x @ w1 + b1
    mean = y.mean(axis=0, keepdims=True)
    var = ((y - mean) ** 2).mean(axis=0, keepdims=True)
    h = (y - mean) / jnp.sqrt(var + _BN_EPS) * gamma + beta
    h = jnp.maximum(h, 0.0)
    r = h @ w2 + b2
    return y + r


if __name__ == "__main__":
    in_dim, out_dim = 16, 32
    key = jax.random.PRNGKey(0)
    kx, kw1, kb1, kw2, kb2, kx2 = jax.random.split(key, 6)

    # Parameters (xavier_normal weights as in the module, PyTorch BN defaults).
    w1 = _xavier_normal(kw1, in_dim, out_dim)                  # pre-transposed
    b1 = 0.01 * jax.random.normal(kb1, (1, out_dim), dtype=jnp.float32)
    w2 = _xavier_normal(kw2, out_dim, out_dim)                 # pre-transposed
    b2 = 0.01 * jax.random.normal(kb2, (1, out_dim), dtype=jnp.float32)
    gamma = jnp.ones((1, out_dim), dtype=jnp.float32)
    beta = jnp.zeros((1, out_dim), dtype=jnp.float32)

    # Case 1: toy batch, single tile.
    x = jax.random.normal(kx, (8, in_dim), dtype=jnp.float32)
    out = resblock_forward(x, w1, b1, gamma, beta, w2, b2)
    jax.block_until_ready(out)
    ref = reference_forward(x, w1, b1, gamma, beta, w2, b2)
    assert out.shape == (8, out_dim)
    assert jnp.allclose(out, ref, atol=2e-4, rtol=2e-4)

    # Case 2: non-multiple batch + multiple tiles (exercises masked stats,
    # batch padding and the grid/pipelined path).
    x2 = jax.random.normal(kx2, (20, in_dim), dtype=jnp.float32)
    out2 = resblock_forward(x2, w1, b1, gamma, beta, w2, b2, block_m=8)
    jax.block_until_ready(out2)
    ref2 = reference_forward(x2, w1, b1, gamma, beta, w2, b2)
    assert out2.shape == (20, out_dim)
    assert jnp.allclose(out2, ref2, atol=2e-4, rtol=2e-4)

    print("KERNEL_OK")
</pallas_src>

<mosaic_0001>
module attributes {stable_mosaic.version = 11 : i64} {
  func.func @_pass1_kernel(%arg0: i32, %arg1: memref<8x128xf32, #tpu.memory_space<vmem>>, %arg2: memref<128x128xf32, #tpu.memory_space<vmem>>, %arg3: memref<1x128xf32, #tpu.memory_space<vmem>>, %arg4: memref<8x128xf32, #tpu.memory_space<vmem>>, %arg5: memref<1x8x128xf32, #tpu.memory_space<vmem>>, %arg6: memref<1x8x128xf32, #tpu.memory_space<vmem>>) attributes {dimension_semantics = [#tpu.dimension_semantics<parallel>], iteration_bounds = array<i64: 1>, scalar_prefetch = 0 : i64, scratch_operands = 0 : i64, tpu.core_type = #tpu.core_type<tc>, window_params = [{transform_indices = @transform_0, window_bounds = array<i64: 8, 128>}, {pipeline_mode = #tpu.pipeline_mode<synchronous>, transform_indices = @transform_1, window_bounds = array<i64: 128, 128>}, {pipeline_mode = #tpu.pipeline_mode<synchronous>, transform_indices = @transform_2, window_bounds = array<i64: 1, 128>}, {transform_indices = @transform_3, window_bounds = array<i64: 8, 128>}, {transform_indices = @transform_4, window_bounds = array<i64: 1, 8, 128>}, {transform_indices = @transform_5, window_bounds = array<i64: 1, 8, 128>}]} {
    %c0 = arith.constant 0 : index
    %c0_0 = arith.constant 0 : index
    %0 = vector.load %arg1[%c0, %c0_0] : memref<8x128xf32, #tpu.memory_space<vmem>>, vector<8x128xf32>
    %c0_1 = arith.constant 0 : index
    %c0_2 = arith.constant 0 : index
    %1 = vector.load %arg2[%c0_1, %c0_2] : memref<128x128xf32, #tpu.memory_space<vmem>>, vector<128x128xf32>
    %cst = arith.constant dense<0.000000e+00> : vector<8x128xf32>
    %2 = tpu.matmul %0, %1, %cst {dimension_numbers = #tpu.dot_dimension_numbers<[1], [0], [0], [1], [0, 0, 1, 1], [], []>} : vector<8x128xf32>, vector<128x128xf32>, vector<8x128xf32> -> vector<8x128xf32>
    %c0_3 = arith.constant 0 : index
    %c0_4 = arith.constant 0 : index
    %3 = vector.load %arg3[%c0_3, %c0_4] : memref<1x128xf32, #tpu.memory_space<vmem>>, vector<1x128xf32>
    %4 = vector.broadcast %3 : vector<1x128xf32> to vector<8x128xf32>
    %5 = arith.addf %2, %4 : vector<8x128xf32>
    %c0_5 = arith.constant 0 : index
    %c0_6 = arith.constant 0 : index
    %6 = vector.load %arg4[%c0_5, %c0_6] : memref<8x128xf32, #tpu.memory_space<vmem>>, vector<8x128xf32>
    tpu.vector_store %arg4[%c0_5, %c0_6], %5 {strides = array<i32>} : memref<8x128xf32, #tpu.memory_space<vmem>>, vector<8x128xf32>,
    %c8_i32 = arith.constant 8 : i32
    %7 = arith.muli %arg0, %c8_i32 : i32
    %8 = tpu.iota {dimensions = array<i32: 0>} : vector<8x128xi32>
    %9 = vector.broadcast %7 : i32 to vector<8x128xi32>
    %10 = arith.addi %9, %8 : vector<8x128xi32>
    %c8_i32_7 = arith.constant 8 : i32
    %11 = vector.broadcast %c8_i32_7 : i32 to vector<8x128xi32>
    %12 = arith.cmpi slt, %10, %11 : vector<8x128xi32>
    %cst_8 = arith.constant 0.000000e+00 : f32
    %13 = vector.broadcast %cst_8 : f32 to vector<8x128xf32>
    %14 = arith.select %12, %5, %13 : vector<8x128xi1>, vector<8x128xf32>
    %cst_9 = arith.constant dense<0.000000e+00> : vector<128xf32>
    %15 = vector.multi_reduction <add>, %14, %cst_9 [0] : vector<8x128xf32> to vector<128xf32>
    %16 = vector.shape_cast %15 : vector<128xf32> to vector<1x128xf32>
    %17 = arith.mulf %14, %14 : vector<8x128xf32>
    %cst_10 = arith.constant dense<0.000000e+00> : vector<128xf32>
    %18 = vector.multi_reduction <add>, %17, %cst_10 [0] : vector<8x128xf32> to vector<128xf32>
    %19 = vector.shape_cast %18 : vector<128xf32> to vector<1x128xf32>
    %20 = vector.shape_cast %16 : vector<1x128xf32> to vector<1x1x128xf32>
    %21 = vector.broadcast %20 : vector<1x1x128xf32> to vector<1x8x128xf32>
    %c0_11 = arith.constant 0 : index
    %c0_12 = arith.constant 0 : index
    %c0_13 = arith.constant 0 : index
    %22 = vector.load %arg5[%c0_11, %c0_12, %c0_13] : memref<1x8x128xf32, #tpu.memory_space<vmem>>, vector<1x8x128xf32>
    tpu.vector_store %arg5[%c0_11, %c0_12, %c0_13], %21 {strides = array<i32>} : memref<1x8x128xf32, #tpu.memory_space<vmem>>, vector<1x8x128xf32>,
    %23 = vector.shape_cast %19 : vector<1x128xf32> to vector<1x1x128xf32>
    %24 = vector.broadcast %23 : vector<1x1x128xf32> to vector<1x8x128xf32>
    %c0_14 = arith.constant 0 : index
    %c0_15 = arith.constant 0 : index
    %c0_16 = arith.constant 0 : index
    %25 = vector.load %arg6[%c0_14, %c0_15, %c0_16] : memref<1x8x128xf32, #tpu.memory_space<vmem>>, vector<1x8x128xf32>
    tpu.vector_store %arg6[%c0_14, %c0_15, %c0_16], %24 {strides = array<i32>} : memref<1x8x128xf32, #tpu.memory_space<vmem>>, vector<1x8x128xf32>,
    return
  }
  func.func @transform_0(%arg0: i32) -> (i32, i32) {
    %c0_i32 = arith.constant 0 : i32
    %c0_i32_0 = arith.constant 0 : i32
    return %arg0, %c0_i32 : i32, i32
  }
  func.func @transform_1(%arg0: i32) -> (i32, i32) {
    %c0_i32 = arith.constant 0 : i32
    %c0_i32_0 = arith.constant 0 : i32
    %c0_i32_1 = arith.constant 0 : i32
    return %c0_i32, %c0_i32_0 : i32, i32
  }
  func.func @transform_2(%arg0: i32) -> (i32, i32) {
    %c0_i32 = arith.constant 0 : i32
    %c0_i32_0 = arith.constant 0 : i32
    %c0_i32_1 = arith.constant 0 : i32
    return %c0_i32, %c0_i32_0 : i32, i32
  }
  func.func @transform_3(%arg0: i32) -> (i32, i32) {
    %c0_i32 = arith.constant 0 : i32
    %c0_i32_0 = arith.constant 0 : i32
    return %arg0, %c0_i32 : i32, i32
  }
  func.func @transform_4(%arg0: i32) -> (i32, i32, i32) {
    %c0_i32 = arith.constant 0 : i32
    %c0_i32_0 = arith.constant 0 : i32
    %c0_i32_1 = arith.constant 0 : i32
    return %arg0, %c0_i32, %c0_i32_0 : i32, i32, i32
  }
  func.func @transform_5(%arg0: i32) -> (i32, i32, i32) {
    %c0_i32 = arith.constant 0 : i32
    %c0_i32_0 = arith.constant 0 : i32
    %c0_i32_1 = arith.constant 0 : i32
    return %arg0, %c0_i32, %c0_i32_0 : i32, i32, i32
  }
}

</mosaic_0001>

<bundles_post_ra>
// kernel: tpu_custom_call.1
= control target key start
LH: loop header
LB: loop body
LE: loop exit
PB: predicated region body
PF: predicated region fallthrough
CT: control target
= control target key end

     0   :  { %11 = vsyncpa [#allocation3], 0  ;;  %s432_s0 = inlined_call_operand.hbm [shape: f32[8,128], index: 0, kind: input, shape index: {}]   ;;  %s433_s1 = inlined_call_operand.hbm [shape: f32[128,128], index: 1, kind: input, shape index: {}]   ;;  %s434_s2 = inlined_call_operand.vmem [shape: f32[1,128], index: 2, kind: input, shape index: {}]   ;;  %s435_s3 = inlined_call_operand.hbm [shape: f32[8,128], index: 3, kind: output, shape index: {0}]   ;;  %s436_s4 = inlined_call_operand.hbm [shape: f32[1,8,128], index: 4, kind: output, shape index: {1}]   ;;  %s437_s5 = inlined_call_operand.hbm [shape: f32[1,8,128], index: 5, kind: output, shape index: {2}]  }
   0x1   :  { %12 = vsyncpa [#allocation6], 0 }
   0x2   :  { %13 = vsyncpa [#allocation4], 0 }
   0x3   :  { %14 = vsyncpa [#allocation9], 0  ;;  %s375_s18 = smov [#allocation2]   ;;  %s376_s20 = smov [#allocation5]  }
   0x4   :  { %s21_s19 = sshll.u32 %s375_s18, 4  ;;  %s30_s21 = sshll.u32 %s376_s20, 4  ;;  %s22_s19 = int_to_ptr.vmem [resolvable:$true] %s21_s19  ;;  %s31_s21 = int_to_ptr.vmem [resolvable:$true] %s30_s21 }
   0x5   :  { %s275_s22 = scalar_lea.vmem %s22_s19, 128  ;;  %p280_p1 = scmp.lt.s32.totalorder %s22_s19, %s22_s19 }
   0x6   :  { %p276_p0 = scmp.ne.s32.totalorder %s22_s19, %s275_s22  ;;  %p281_p2 = scmp.lt.s32.totalorder %s275_s22, %s275_s22 }
   0x8   :  { %p282_p3 = por %p281_p2, %p280_p1 }
   0xa   :  { %p283_p4 = pnand %p282_p3, %p276_p0 }
   0xc   :  { %286 = shalt.err (!%p283_p4)
}
   0xd   :  { %24 = dma.hbm_to_vmem [thread:$0]  %s432_s0, 128, %s22_s19, [#allocation3]  }
   0xe   :  { %s295_s25 = scalar_lea.vmem %s31_s21, 2048  ;;  %p300_p6 = scmp.lt.s32.totalorder %s31_s21, %s31_s21 }
   0xf   :  { %p296_p5 = scmp.ne.s32.totalorder %s31_s21, %s295_s25  ;;  %p301_p7 = scmp.lt.s32.totalorder %s295_s25, %s295_s25 }
  0x11   :  { %p302_p8 = por %p301_p7, %p300_p6 }
  0x13   :  { %p303_p9 = pnand %p302_p8, %p296_p5 }
  0x15   :  { %306 = shalt.err (!%p303_p9)
}
  0x16   :  { %s377_s26 = smov 128   ;;  %s378_s27 = smov 8  }
  0x17   :  { %36 = dma.hbm_to_vmem [thread:$0]  %s433_s1, 2048, %s31_s21, [#allocation6], %s377_s26, %s377_s26, %s378_s27  }
  0x18   :  { %367 = dma.done.wait [#allocation3], 128  }
  0x19   :  { %368 = vsyncadd [#allocation3], 4294967168 }
  0x1a   :  { %369 = dma.done.wait [#allocation6], 2048  }
  0x1b   :  { %370 = vsyncadd [#allocation6], 4294965248  ;;  %v379_v0 = vmov 0.0   ;;  %vm380_vm0 = vmmov 0   ;;  %v61_v1 = vld [vmem:[#allocation5 + $0x78] sm:$0xff]  ;;  %v60_v2 = vld [vmem:[#allocation5 + $0x70] sm:$0xff] }
  0x1c   :  { %223 = vmatprep.subr.mxu0 %v379_v0  ;;  %255 = vmatprep.mubr.msk.f32.mxu0 %vm380_vm0, %v379_v0  ;;  %v59_v3 = vld [vmem:[#allocation5 + $0x68] sm:$0xff]  ;;  %v58_v4 = vld [vmem:[#allocation5 + $0x60] sm:$0xff]  ;;  %v57_v5 = vld [vmem:[#allocation5 + $0x58] sm:$0xff]  ;;  %s381_s30 = smov [#allocation7]  }
  0x1d   :  { %224 = vmatpush3.msra.mxu0 %v61_v1  ;;  %v56_v6 = vld [vmem:[#allocation5 + $0x50] sm:$0xff]  ;;  %v55_v7 = vld [vmem:[#allocation5 + $0x48] sm:$0xff]  ;;  %v54_v8 = vld [vmem:[#allocation5 + $0x40] sm:$0xff]  ;;  %s168_s6 = sshll.u32 %s381_s30, 4  ;;  %s169_s6 = int_to_ptr.vmem [resolvable:$true] %s168_s6 }
  0x1e   :  { %225 = vmatprep.subr.mxu0 %v379_v0  ;;  %v53_v9 = vld [vmem:[#allocation5 + $0x38] sm:$0xff]  ;;  %v52_v10 = vld [vmem:[#allocation5 + $0x30] sm:$0xff]  ;;  %v51_v11 = vld [vmem:[#allocation5 + $0x28] sm:$0xff]  ;;  %s307_s7 = scalar_lea.vmem %s169_s6, 128  ;;  %p312_p11 = scmp.lt.s32.totalorder %s169_s6, %s169_s6 }
  0x1f   :  { %226 = vmatpush3.msra.mxu0 %v60_v2  ;;  %v50_v12 = vld [vmem:[#allocation5 + $0x20] sm:$0xff]  ;;  %v49_v13 = vld [vmem:[#allocation5 + $0x18] sm:$0xff]  ;;  %v48_v14 = vld [vmem:[#allocation5 + $0x10] sm:$0xff]  ;;  %p308_p10 = scmp.ne.s32.totalorder %s169_s6, %s307_s7  ;;  %p313_p12 = scmp.lt.s32.totalorder %s307_s7, %s307_s7 }
  0x20   :  { %227 = vmatprep.subr.mxu0 %v379_v0  ;;  %v47_v15 = vld [vmem:[#allocation5 + $0x8] sm:$0xff]  ;;  %v46_v16 = vld [vmem:[#allocation5] sm:$0xff]  ;;  %v45_v17 = vld [vmem:[#allocation2] sm:$0xff] }
  0x21   :  { %228 = vmatpush3.msra.mxu0 %v59_v3  ;;  %v205_v18 = vld [vmem:[%s434_s2] ss:$0 sm:$0xff]  ;;  %p314_p13 = por %p313_p12, %p312_p11 }
  0x22   :  { %229 = vmatprep.subr.mxu0 %v379_v0 }
  0x23   :  { %230 = vmatpush3.msra.mxu0 %v58_v4  ;;  %p315_p0 = pnand %p314_p13, %p308_p10 }
  0x24   :  { %231 = vmatprep.subr.mxu0 %v379_v0 }
  0x25   :  { %232 = vmatpush3.msra.mxu0 %v57_v5 }
  0x26   :  { %233 = vmatprep.subr.mxu0 %v379_v0 }
  0x27   :  { %234 = vmatpush3.msra.mxu0 %v56_v6 }
  0x28   :  { %235 = vmatprep.subr.mxu0 %v379_v0 }
  0x29   :  { %236 = vmatpush3.msra.mxu0 %v55_v7 }
  0x2a   :  { %237 = vmatprep.subr.mxu0 %v379_v0 }
  0x2b   :  { %238 = vmatpush3.msra.mxu0 %v54_v8 }
  0x2c   :  { %239 = vmatprep.subr.mxu0 %v379_v0 }
  0x2d   :  { %240 = vmatpush3.msra.mxu0 %v53_v9 }
  0x2e   :  { %241 = vmatprep.subr.mxu0 %v379_v0 }
  0x2f   :  { %242 = vmatpush3.msra.mxu0 %v52_v10 }
  0x30   :  { %243 = vmatprep.subr.mxu0 %v379_v0 }
  0x31   :  { %244 = vmatpush3.msra.mxu0 %v51_v11 }
  0x32   :  { %245 = vmatprep.subr.mxu0 %v379_v0 }
  0x33   :  { %246 = vmatpush3.msra.mxu0 %v50_v12 }
  0x34   :  { %247 = vmatprep.subr.mxu0 %v379_v0 }
  0x35   :  { %248 = vmatpush3.msra.mxu0 %v49_v13 }
  0x36   :  { %249 = vmatprep.subr.mxu0 %v379_v0 }
  0x37   :  { %250 = vmatpush3.msra.mxu0 %v48_v14 }
  0x38   :  { %251 = vmatprep.subr.mxu0 %v379_v0 }
  0x39   :  { %252 = vmatpush3.msra.mxu0 %v47_v15 }
  0x3a   :  { %253 = vmatprep.subr.mxu0 %v379_v0 }
  0x3b   :  { %254 = vmatpush3.msra.mxu0 %v46_v16 }
  0x3c   :  { %256 = vmatmul.mubr.f32.vlgmr.msra.gmra.mxu0 %v45_v17 }
  0xfc   :  { %v135_v19 = vpop.f32.mrf.mxu0 }
  0xfd   :  { %v136_v20 = vadd.f32 %v205_v18, %v135_v19 }
  0xfe   :  { %v257_v21 = vpop.f32.mrf.mxu0 }
  0xff   :  { %v147_v22 = vrot.slane %v136_v20, 4  ;;  %v153_v23 = vmul.f32 %v136_v20, %v136_v20  ;;  %139 = vst [vmem:[#allocation7] sm:$0xff] %v136_v20 }
 0x100   :  { %318 = shalt.err (!%p315_p0)
}
 0x101   :  { %171 = dma.vmem_to_hbm [thread:$0]  %s169_s6, 128, %s435_s3, [#allocation4]   ;;  %v154_v24 = vrot.slane %v153_v23, 4  ;;  %v148_v25 = vadd.f32 %v147_v22, %v136_v20 }
 0x102   :  { %s382_s2 = smov [#allocation8]   ;;  %s383_s11 = smov [#allocation10]  }
 0x103   :  { %v149_v26 = vrot.slane %v148_v25, 2  ;;  %v155_v27 = vadd.f32 %v154_v24, %v153_v23  ;;  %s178_s10 = sshll.u32 %s382_s2, 4  ;;  %s188_s12 = sshll.u32 %s383_s11, 4  ;;  %s179_s10 = int_to_ptr.vmem [resolvable:$true] %s178_s10  ;;  %s189_s12 = int_to_ptr.vmem [resolvable:$true] %s188_s12 }
 0x104   :  { %s327_s13 = scalar_lea.vmem %s179_s10, 128  ;;  %p332_p2 = scmp.lt.s32.totalorder %s179_s10, %s179_s10 }
 0x105   :  { %v150_v28 = vadd.f32 %v149_v26, %v148_v25  ;;  %v156_v29 = vrot.slane %v155_v27, 2  ;;  %p328_p1 = scmp.ne.s32.totalorder %s179_s10, %s327_s13  ;;  %p333_p3 = scmp.lt.s32.totalorder %s327_s13, %s327_s13 }
 0x107   :  { %v151_v30 = vrot.slane %v150_v28, 1  ;;  %v157_v31 = vadd.f32 %v156_v29, %v155_v27  ;;  %p334_p4 = por %p333_p3, %p332_p2 }
 0x109   :  { %v152_v32 = vadd.f32 %v151_v30, %v150_v28  ;;  %v158_v33 = vrot.slane %v157_v31, 1  ;;  %p335_p5 = pnand %p334_p4, %p328_p1 }
 0x10b   :  { %160 = vst [vmem:[#allocation8] sm:$0xff] %v152_v32  ;;  %v159_v34 = vadd.f32 %v158_v33, %v157_v31 }
 0x10c   :  { %338 = shalt.err (!%p335_p5)
}
 0x10d   :  { %181 = dma.vmem_to_hbm [thread:$0]  %s179_s10, 128, %s436_s4, [#allocation9]   ;;  %161 = vst [vmem:[#allocation10] sm:$0xff] %v159_v34 }
 0x10e   :  { %s347_s15 = scalar_lea.vmem %s189_s12, 128  ;;  %p352_p7 = scmp.lt.s32.totalorder %s189_s12, %s189_s12 }
 0x10f   :  { %p348_p6 = scmp.ne.s32.totalorder %s189_s12, %s347_s15  ;;  %p353_p8 = scmp.lt.s32.totalorder %s347_s15, %s347_s15 }
 0x111   :  { %p354_p9 = por %p353_p8, %p352_p7 }
 0x113   :  { %p355_p10 = pnand %p354_p9, %p348_p6 }
 0x115   :  { %358 = shalt.err (!%p355_p10)
}
 0x116   :  { %191 = dma.vmem_to_hbm [thread:$0]  %s189_s12, 128, %s437_s5, [#allocation9]  }
 0x117   :  { %371 = dma.done.wait [#allocation4], 128  }
 0x118   :  { %372 = vsyncadd [#allocation4], 4294967168 }
 0x119   :  { %373 = dma.done.wait [#allocation9], 256  }
 0x11a   :  { %374 = vsyncadd [#allocation9], 4294967040 }
 0x11b   :  { %201 = vsyncpa [#allocation3], 1 }
 0x11c   :  { %202 = vsyncpa [#allocation6], 1 }
 0x11d   :  { %203 = vsyncpa [#allocation4], 1 }
 0x11e   :  { %204 = vsyncpa [#allocation9], 1 }

</bundles_post_ra>
